<compile_context>
chip_gen: v5e
topology: v5e:2x2
jax: 0.10.0
libtpu: 0.0.40
codegen_flags: <defaults>
</compile_context>

<pallas_src>
import jax
import jax.numpy as jnp
from jax.experimental import pallas as pl
from jax.experimental.pallas import tpu as pltpu


def _round_up(n, m):
    return ((n + m - 1) // m) * m


# ----------------------------------------------------------------------------
# Kernel
# ----------------------------------------------------------------------------
def lstm_fc_kernel(x_ref, w_ref, fc_ref, out_ref):
    """x_ref: (B,S,D); w_ref: packed (d_pad+H+8, 4H); fc_ref: packed (·, O);
    out_ref: (B, O).  Gate columns of w_ref are pre-scaled so that a single
    tanh produces tanh(x/2) for i/f/o and tanh(x) for g."""
    B, S, D = x_ref.shape
    G = w_ref.shape[1]                 # 4H
    H = G // 4
    d_pad = _round_up(D, 8)            # sublane-aligned section offsets

    # Loop-invariant parameter loads (all off the serial h/c chain).
    w_ih = w_ref[0:D, :]                           # (D, 4H), pre-scaled
    w_hh = w_ref[d_pad:d_pad + H, :]               # (H, 4H), pre-scaled
    bias = w_ref[d_pad + H:d_pad + H + 1, :]       # (1, 4H), pre-scaled

    # Hoisted input projection: ONE (B*S, D) x (D, 4H) MXU call for all
    # timesteps; result stays in registers (no VMEM scratch).
    xf = x_ref[...].reshape(B * S, D)
    gx = jnp.dot(xf, w_ih, preferred_element_type=jnp.float32) + bias
    gx = gx.reshape(B, S, G)

    h = jnp.zeros((B, H), jnp.float32)
    c = jnp.zeros((B, H), jnp.float32)

    # Serial LSTM recurrence, fully unrolled (S is small and static).
    # Per step: one tiny MXU matmul + ONE full-width tanh (EUP) + one tanh(c).
    for t in range(S):
        pre = gx[:, t, :] + jnp.dot(h, w_hh,
                                    preferred_element_type=jnp.float32)
        v = jnp.tanh(pre)                              # single EUP push, 4H wide
        # torch gate order i, f, g, o; i/f/o columns were pre-scaled by 0.5,
        # so 0.5*(tanh+1) == sigmoid of the original pre-activation.
        i_g = 0.5 * v[:, 0 * H:1 * H] + 0.5
        f_g = 0.5 * v[:, 1 * H:2 * H] + 0.5
        g_g = v[:, 2 * H:3 * H]
        o_g = 0.5 * v[:, 3 * H:4 * H] + 0.5
        c = f_g * c + i_g * g_g
        h = o_g * jnp.tanh(c)

    # Fused FC on the last hidden state (torch: fc(out[:, -1, :])).
    w_fc = fc_ref[0:H, :]
    b_fc = fc_ref[H:H + 1, :]
    y = jnp.dot(h, w_fc, preferred_element_type=jnp.float32) + b_fc
    out_ref[...] = y.astype(out_ref.dtype)


# ----------------------------------------------------------------------------
# Wrapper
# ----------------------------------------------------------------------------
def rnn_forward(x, w_pack, fc_pack):
    """x: (B, S, D) float32 (batch_first, like the PyTorch module)."""
    B, S, D = x.shape
    O = fc_pack.shape[1]

    # Single grid-less invocation: every operand is one whole-array VMEM block
    # (a few KiB total) -> no per-step pipeline overhead, no double-buffering
    # of loop-invariant weights.
    y = pl.pallas_call(
        lstm_fc_kernel,
        out_shape=jax.ShapeDtypeStruct((B, O), jnp.float32),
        in_specs=[pl.BlockSpec(memory_space=pltpu.MemorySpace.VMEM)] * 3,
        out_specs=pl.BlockSpec(memory_space=pltpu.MemorySpace.VMEM),
    )(x, w_pack, fc_pack)

    # torch: fc(out[:, -1, :]).unsqueeze(1) -> (B, 1, O); free layout plumbing.
    return y[:, None, :].astype(x.dtype)


# ----------------------------------------------------------------------------
# Parameters
# ----------------------------------------------------------------------------
def init_params(key, input_dim, hidden_dim, output_dim):
    """Raw torch-layout params, init mimicking U(-1/sqrt(H), 1/sqrt(H))."""
    ks = jax.random.split(key, 6)
    bound = 1.0 / jnp.sqrt(jnp.float32(hidden_dim))

    def u(k, shape):
        return jax.random.uniform(k, shape, jnp.float32, -bound, bound)

    return {
        "w_ih": u(ks[0], (4 * hidden_dim, input_dim)),    # weight_ih_l0
        "w_hh": u(ks[1], (4 * hidden_dim, hidden_dim)),   # weight_hh_l0
        "b_ih": u(ks[2], (4 * hidden_dim,)),
        "b_hh": u(ks[3], (4 * hidden_dim,)),
        "w_fc": u(ks[4], (output_dim, hidden_dim)),       # fc.weight
        "b_fc": u(ks[5], (output_dim,)),
    }


def pack_params(p):
    """One-time (init-time) packing: transpose, fold b_ih+b_hh, fold the 0.5
    sigmoid-via-tanh pre-scale into the i/f/o gate columns, and concatenate
    into two sublane-aligned VMEM blocks."""
    H4, D = p["w_ih"].shape
    H = H4 // 4
    O = p["w_fc"].shape[0]
    d_pad = _round_up(D, 8)

    # Gate order i, f, g, o: sigmoid gates (i, f, o) get the 0.5 pre-scale.
    col_scale = jnp.concatenate([
        jnp.full((2 * H,), 0.5, jnp.float32),   # i, f
        jnp.full((H,), 1.0, jnp.float32),       # g (tanh)
        jnp.full((H,), 0.5, jnp.float32),       # o
    ])

    w_ih_t = p["w_ih"].T * col_scale[None, :]              # (D, 4H)
    w_hh_t = p["w_hh"].T * col_scale[None, :]              # (H, 4H)
    bias = (p["b_ih"] + p["b_hh"]) * col_scale              # (4H,)

    rows = d_pad + H + 8
    w_pack = jnp.zeros((rows, H4), jnp.float32)
    w_pack = w_pack.at[:D].set(w_ih_t)
    w_pack = w_pack.at[d_pad:d_pad + H].set(w_hh_t)
    w_pack = w_pack.at[d_pad + H].set(bias)

    fc_rows = _round_up(H + 1, 8)
    fc_pack = jnp.zeros((fc_rows, O), jnp.float32)
    fc_pack = fc_pack.at[:H].set(p["w_fc"].T)               # (H, O)
    fc_pack = fc_pack.at[H].set(p["b_fc"])
    return w_pack, fc_pack


# ----------------------------------------------------------------------------
# Pure-JAX reference (independent of the kernel's packing / tanh trick)
# ----------------------------------------------------------------------------
def reference_forward(x, p):
    B, S, D = x.shape
    H = p["w_hh"].shape[1]
    w_ih_t = p["w_ih"].T
    w_hh_t = p["w_hh"].T
    b = (p["b_ih"] + p["b_hh"])[None, :]
    h = jnp.zeros((B, H), jnp.float32)
    c = jnp.zeros((B, H), jnp.float32)
    for t in range(S):
        gates = x[:, t, :] @ w_ih_t + h @ w_hh_t + b
        i = jax.nn.sigmoid(gates[:, 0 * H:1 * H])
        f = jax.nn.sigmoid(gates[:, 1 * H:2 * H])
        g = jnp.tanh(gates[:, 2 * H:3 * H])
        o = jax.nn.sigmoid(gates[:, 3 * H:4 * H])
        c = f * c + i * g
        h = o * jnp.tanh(c)
    y = h @ p["w_fc"].T + p["b_fc"][None, :]
    return y[:, None, :]


if __name__ == "__main__":
    # Module config: RNN('lstm', input_dim=4, output_dim=3, hidden_dim=16,
    #                    num_layers=1, dropout=0.0, bidirectional=False)
    B, S, D, H, O = 2, 8, 4, 16, 3

    key = jax.random.PRNGKey(0)
    kx, kp = jax.random.split(key)
    x = jax.random.normal(kx, (B, S, D), dtype=jnp.float32)
    params = init_params(kp, D, H, O)
    w_pack, fc_pack = pack_params(params)

    fwd = jax.jit(rnn_forward)
    out = jax.block_until_ready(fwd(x, w_pack, fc_pack))

    ref = reference_forward(x, params)
    assert out.shape == (B, 1, O), out.shape
    assert jnp.allclose(out, ref, atol=1e-5, rtol=1e-5), (out, ref)

    print("KERNEL_OK")
</pallas_src>

<mosaic_0001>
module attributes {stable_mosaic.version = 11 : i64} {
  func.func @lstm_fc_kernel(%arg0: memref<2x8x4xf32, #tpu.memory_space<vmem>>, %arg1: memref<32x64xf32, #tpu.memory_space<vmem>>, %arg2: memref<24x3xf32, #tpu.memory_space<vmem>>, %arg3: memref<2x3xf32, #tpu.memory_space<vmem>>) attributes {dimension_semantics = [], scalar_prefetch = 0 : i64, scratch_operands = 0 : i64, tpu.core_type = #tpu.core_type<tc>} {
    %c0 = arith.constant 0 : index
    %c0_0 = arith.constant 0 : index
    %0 = vector.load %arg1[%c0, %c0_0] : memref<32x64xf32, #tpu.memory_space<vmem>>, vector<4x64xf32>
    %c8 = arith.constant 8 : index
    %c0_1 = arith.constant 0 : index
    %1 = vector.load %arg1[%c8, %c0_1] : memref<32x64xf32, #tpu.memory_space<vmem>>, vector<16x64xf32>
    %c24 = arith.constant 24 : index
    %c0_2 = arith.constant 0 : index
    %2 = vector.load %arg1[%c24, %c0_2] : memref<32x64xf32, #tpu.memory_space<vmem>>, vector<1x64xf32>
    %c0_3 = arith.constant 0 : index
    %c0_4 = arith.constant 0 : index
    %c0_5 = arith.constant 0 : index
    %3 = vector.load %arg0[%c0_3, %c0_4, %c0_5] : memref<2x8x4xf32, #tpu.memory_space<vmem>>, vector<2x8x4xf32>
    %4 = vector.shape_cast %3 : vector<2x8x4xf32> to vector<16x4xf32>
    %cst = arith.constant dense<0.000000e+00> : vector<16x64xf32>
    %5 = tpu.matmul %4, %0, %cst {dimension_numbers = #tpu.dot_dimension_numbers<[1], [0], [0], [1], [0, 0, 1, 1], [], []>} : vector<16x4xf32>, vector<4x64xf32>, vector<16x64xf32> -> vector<16x64xf32>
    %6 = vector.broadcast %2 : vector<1x64xf32> to vector<16x64xf32>
    %7 = arith.addf %5, %6 : vector<16x64xf32>
    %8 = vector.shape_cast %7 : vector<16x64xf32> to vector<2x8x64xf32>
    %cst_6 = arith.constant 0.000000e+00 : f32
    %9 = vector.broadcast %cst_6 : f32 to vector<2x16xf32>
    %cst_7 = arith.constant 0.000000e+00 : f32
    %10 = vector.broadcast %cst_7 : f32 to vector<2x16xf32>
    %11 = vector.extract_strided_slice %8 {offsets = [0, 0, 0], sizes = [2, 1, 64], strides = [1, 1, 1]} : vector<2x8x64xf32> to vector<2x1x64xf32>
    %12 = vector.shape_cast %11 : vector<2x1x64xf32> to vector<2x64xf32>
    %cst_8 = arith.constant dense<0.000000e+00> : vector<2x64xf32>
    %13 = tpu.matmul %9, %1, %cst_8 {dimension_numbers = #tpu.dot_dimension_numbers<[1], [0], [0], [1], [0, 0, 1, 1], [], []>} : vector<2x16xf32>, vector<16x64xf32>, vector<2x64xf32> -> vector<2x64xf32>
    %14 = arith.addf %12, %13 : vector<2x64xf32>
    %15 = math.tanh %14 : vector<2x64xf32>
    %16 = vector.extract_strided_slice %15 {offsets = [0, 0], sizes = [2, 16], strides = [1, 1]} : vector<2x64xf32> to vector<2x16xf32>
    %cst_9 = arith.constant 5.000000e-01 : f32
    %17 = vector.broadcast %cst_9 : f32 to vector<2x16xf32>
    %18 = arith.mulf %17, %16 : vector<2x16xf32>
    %cst_10 = arith.constant 5.000000e-01 : f32
    %19 = vector.broadcast %cst_10 : f32 to vector<2x16xf32>
    %20 = arith.addf %18, %19 : vector<2x16xf32>
    %21 = vector.extract_strided_slice %15 {offsets = [0, 16], sizes = [2, 16], strides = [1, 1]} : vector<2x64xf32> to vector<2x16xf32>
    %cst_11 = arith.constant 5.000000e-01 : f32
    %22 = vector.broadcast %cst_11 : f32 to vector<2x16xf32>
    %23 = arith.mulf %22, %21 : vector<2x16xf32>
    %cst_12 = arith.constant 5.000000e-01 : f32
    %24 = vector.broadcast %cst_12 : f32 to vector<2x16xf32>
    %25 = arith.addf %23, %24 : vector<2x16xf32>
    %26 = vector.extract_strided_slice %15 {offsets = [0, 32], sizes = [2, 16], strides = [1, 1]} : vector<2x64xf32> to vector<2x16xf32>
    %27 = vector.extract_strided_slice %15 {offsets = [0, 48], sizes = [2, 16], strides = [1, 1]} : vector<2x64xf32> to vector<2x16xf32>
    %cst_13 = arith.constant 5.000000e-01 : f32
    %28 = vector.broadcast %cst_13 : f32 to vector<2x16xf32>
    %29 = arith.mulf %28, %27 : vector<2x16xf32>
    %cst_14 = arith.constant 5.000000e-01 : f32
    %30 = vector.broadcast %cst_14 : f32 to vector<2x16xf32>
    %31 = arith.addf %29, %30 : vector<2x16xf32>
    %32 = arith.mulf %25, %10 : vector<2x16xf32>
    %33 = arith.mulf %20, %26 : vector<2x16xf32>
    %34 = arith.addf %32, %33 : vector<2x16xf32>
    %35 = math.tanh %34 : vector<2x16xf32>
    %36 = arith.mulf %31, %35 : vector<2x16xf32>
    %37 = vector.extract_strided_slice %8 {offsets = [0, 1, 0], sizes = [2, 1, 64], strides = [1, 1, 1]} : vector<2x8x64xf32> to vector<2x1x64xf32>
    %38 = vector.shape_cast %37 : vector<2x1x64xf32> to vector<2x64xf32>
    %cst_15 = arith.constant dense<0.000000e+00> : vector<2x64xf32>
    %39 = tpu.matmul %36, %1, %cst_15 {dimension_numbers = #tpu.dot_dimension_numbers<[1], [0], [0], [1], [0, 0, 1, 1], [], []>} : vector<2x16xf32>, vector<16x64xf32>, vector<2x64xf32> -> vector<2x64xf32>
    %40 = arith.addf %38, %39 : vector<2x64xf32>
    %41 = math.tanh %40 : vector<2x64xf32>
    %42 = vector.extract_strided_slice %41 {offsets = [0, 0], sizes = [2, 16], strides = [1, 1]} : vector<2x64xf32> to vector<2x16xf32>
    %cst_16 = arith.constant 5.000000e-01 : f32
    %43 = vector.broadcast %cst_16 : f32 to vector<2x16xf32>
    %44 = arith.mulf %43, %42 : vector<2x16xf32>
    %cst_17 = arith.constant 5.000000e-01 : f32
    %45 = vector.broadcast %cst_17 : f32 to vector<2x16xf32>
    %46 = arith.addf %44, %45 : vector<2x16xf32>
    %47 = vector.extract_strided_slice %41 {offsets = [0, 16], sizes = [2, 16], strides = [1, 1]} : vector<2x64xf32> to vector<2x16xf32>
    %cst_18 = arith.constant 5.000000e-01 : f32
    %48 = vector.broadcast %cst_18 : f32 to vector<2x16xf32>
    %49 = arith.mulf %48, %47 : vector<2x16xf32>
    %cst_19 = arith.constant 5.000000e-01 : f32
    %50 = vector.broadcast %cst_19 : f32 to vector<2x16xf32>
    %51 = arith.addf %49, %50 : vector<2x16xf32>
    %52 = vector.extract_strided_slice %41 {offsets = [0, 32], sizes = [2, 16], strides = [1, 1]} : vector<2x64xf32> to vector<2x16xf32>
    %53 = vector.extract_strided_slice %41 {offsets = [0, 48], sizes = [2, 16], strides = [1, 1]} : vector<2x64xf32> to vector<2x16xf32>
    %cst_20 = arith.constant 5.000000e-01 : f32
    %54 = vector.broadcast %cst_20 : f32 to vector<2x16xf32>
    %55 = arith.mulf %54, %53 : vector<2x16xf32>
    %cst_21 = arith.constant 5.000000e-01 : f32
    %56 = vector.broadcast %cst_21 : f32 to vector<2x16xf32>
    %57 = arith.addf %55, %56 : vector<2x16xf32>
    %58 = arith.mulf %51, %34 : vector<2x16xf32>
    %59 = arith.mulf %46, %52 : vector<2x16xf32>
    %60 = arith.addf %58, %59 : vector<2x16xf32>
    %61 = math.tanh %60 : vector<2x16xf32>
    %62 = arith.mulf %57, %61 : vector<2x16xf32>
    %63 = vector.extract_strided_slice %8 {offsets = [0, 2, 0], sizes = [2, 1, 64], strides = [1, 1, 1]} : vector<2x8x64xf32> to vector<2x1x64xf32>
    %64 = vector.shape_cast %63 : vector<2x1x64xf32> to vector<2x64xf32>
    %cst_22 = arith.constant dense<0.000000e+00> : vector<2x64xf32>
    %65 = tpu.matmul %62, %1, %cst_22 {dimension_numbers = #tpu.dot_dimension_numbers<[1], [0], [0], [1], [0, 0, 1, 1], [], []>} : vector<2x16xf32>, vector<16x64xf32>, vector<2x64xf32> -> vector<2x64xf32>
    %66 = arith.addf %64, %65 : vector<2x64xf32>
    %67 = math.tanh %66 : vector<2x64xf32>
    %68 = vector.extract_strided_slice %67 {offsets = [0, 0], sizes = [2, 16], strides = [1, 1]} : vector<2x64xf32> to vector<2x16xf32>
    %cst_23 = arith.constant 5.000000e-01 : f32
    %69 = vector.broadcast %cst_23 : f32 to vector<2x16xf32>
    %70 = arith.mulf %69, %68 : vector<2x16xf32>
    %cst_24 = arith.constant 5.000000e-01 : f32
    %71 = vector.broadcast %cst_24 : f32 to vector<2x16xf32>
    %72 = arith.addf %70, %71 : vector<2x16xf32>
    %73 = vector.extract_strided_slice %67 {offsets = [0, 16], sizes = [2, 16], strides = [1, 1]} : vector<2x64xf32> to vector<2x16xf32>
    %cst_25 = arith.constant 5.000000e-01 : f32
    %74 = vector.broadcast %cst_25 : f32 to vector<2x16xf32>
    %75 = arith.mulf %74, %73 : vector<2x16xf32>
    %cst_26 = arith.constant 5.000000e-01 : f32
    %76 = vector.broadcast %cst_26 : f32 to vector<2x16xf32>
    %77 = arith.addf %75, %76 : vector<2x16xf32>
    %78 = vector.extract_strided_slice %67 {offsets = [0, 32], sizes = [2, 16], strides = [1, 1]} : vector<2x64xf32> to vector<2x16xf32>
    %79 = vector.extract_strided_slice %67 {offsets = [0, 48], sizes = [2, 16], strides = [1, 1]} : vector<2x64xf32> to vector<2x16xf32>
    %cst_27 = arith.constant 5.000000e-01 : f32
    %80 = vector.broadcast %cst_27 : f32 to vector<2x16xf32>
    %81 = arith.mulf %80, %79 : vector<2x16xf32>
    %cst_28 = arith.constant 5.000000e-01 : f32
    %82 = vector.broadcast %cst_28 : f32 to vector<2x16xf32>
    %83 = arith.addf %81, %82 : vector<2x16xf32>
    %84 = arith.mulf %77, %60 : vector<2x16xf32>
    %85 = arith.mulf %72, %78 : vector<2x16xf32>
    %86 = arith.addf %84, %85 : vector<2x16xf32>
    %87 = math.tanh %86 : vector<2x16xf32>
    %88 = arith.mulf %83, %87 : vector<2x16xf32>
    %89 = vector.extract_strided_slice %8 {offsets = [0, 3, 0], sizes = [2, 1, 64], strides = [1, 1, 1]} : vector<2x8x64xf32> to vector<2x1x64xf32>
    %90 = vector.shape_cast %89 : vector<2x1x64xf32> to vector<2x64xf32>
    %cst_29 = arith.constant dense<0.000000e+00> : vector<2x64xf32>
    %91 = tpu.matmul %88, %1, %cst_29 {dimension_numbers = #tpu.dot_dimension_numbers<[1], [0], [0], [1], [0, 0, 1, 1], [], []>} : vector<2x16xf32>, vector<16x64xf32>, vector<2x64xf32> -> vector<2x64xf32>
    %92 = arith.addf %90, %91 : vector<2x64xf32>
    %93 = math.tanh %92 : vector<2x64xf32>
    %94 = vector.extract_strided_slice %93 {offsets = [0, 0], sizes = [2, 16], strides = [1, 1]} : vector<2x64xf32> to vector<2x16xf32>
    %cst_30 = arith.constant 5.000000e-01 : f32
    %95 = vector.broadcast %cst_30 : f32 to vector<2x16xf32>
    %96 = arith.mulf %95, %94 : vector<2x16xf32>
    %cst_31 = arith.constant 5.000000e-01 : f32
    %97 = vector.broadcast %cst_31 : f32 to vector<2x16xf32>
    %98 = arith.addf %96, %97 : vector<2x16xf32>
    %99 = vector.extract_strided_slice %93 {offsets = [0, 16], sizes = [2, 16], strides = [1, 1]} : vector<2x64xf32> to vector<2x16xf32>
    %cst_32 = arith.constant 5.000000e-01 : f32
    %100 = vector.broadcast %cst_32 : f32 to vector<2x16xf32>
    %101 = arith.mulf %100, %99 : vector<2x16xf32>
    %cst_33 = arith.constant 5.000000e-01 : f32
    %102 = vector.broadcast %cst_33 : f32 to vector<2x16xf32>
    %103 = arith.addf %101, %102 : vector<2x16xf32>
    %104 = vector.extract_strided_slice %93 {offsets = [0, 32], sizes = [2, 16], strides = [1, 1]} : vector<2x64xf32> to vector<2x16xf32>
    %105 = vector.extract_strided_slice %93 {offsets = [0, 48], sizes = [2, 16], strides = [1, 1]} : vector<2x64xf32> to vector<2x16xf32>
    %cst_34 = arith.constant 5.000000e-01 : f32
    %106 = vector.broadcast %cst_34 : f32 to vector<2x16xf32>
    %107 = arith.mulf %106, %105 : vector<2x16xf32>
    %cst_35 = arith.constant 5.000000e-01 : f32
    %108 = vector.broadcast %cst_35 : f32 to vector<2x16xf32>
    %109 = arith.addf %107, %108 : vector<2x16xf32>
    %110 = arith.mulf %103, %86 : vector<2x16xf32>
    %111 = arith.mulf %98, %104 : vector<2x16xf32>
    %112 = arith.addf %110, %111 : vector<2x16xf32>
    %113 = math.tanh %112 : vector<2x16xf32>
    %114 = arith.mulf %109, %113 : vector<2x16xf32>
    %115 = vector.extract_strided_slice %8 {offsets = [0, 4, 0], sizes = [2, 1, 64], strides = [1, 1, 1]} : vector<2x8x64xf32> to vector<2x1x64xf32>
    %116 = vector.shape_cast %115 : vector<2x1x64xf32> to vector<2x64xf32>
    %cst_36 = arith.constant dense<0.000000e+00> : vector<2x64xf32>
    %117 = tpu.matmul %114, %1, %cst_36 {dimension_numbers = #tpu.dot_dimension_numbers<[1], [0], [0], [1], [0, 0, 1, 1], [], []>} : vector<2x16xf32>, vector<16x64xf32>, vector<2x64xf32> -> vector<2x64xf32>
    %118 = arith.addf %116, %117 : vector<2x64xf32>
    %119 = math.tanh %118 : vector<2x64xf32>
    %120 = vector.extract_strided_slice %119 {offsets = [0, 0], sizes = [2, 16], strides = [1, 1]} : vector<2x64xf32> to vector<2x16xf32>
    %cst_37 = arith.constant 5.000000e-01 : f32
    %121 = vector.broadcast %cst_37 : f32 to vector<2x16xf32>
    %122 = arith.mulf %121, %120 : vector<2x16xf32>
    %cst_38 = arith.constant 5.000000e-01 : f32
    %123 = vector.broadcast %cst_38 : f32 to vector<2x16xf32>
    %124 = arith.addf %122, %123 : vector<2x16xf32>
    %125 = vector.extract_strided_slice %119 {offsets = [0, 16], sizes = [2, 16], strides = [1, 1]} : vector<2x64xf32> to vector<2x16xf32>
    %cst_39 = arith.constant 5.000000e-01 : f32
    %126 = vector.broadcast %cst_39 : f32 to vector<2x16xf32>
    %127 = arith.mulf %126, %125 : vector<2x16xf32>
    %cst_40 = arith.constant 5.000000e-01 : f32
    %128 = vector.broadcast %cst_40 : f32 to vector<2x16xf32>
    %129 = arith.addf %127, %128 : vector<2x16xf32>
    %130 = vector.extract_strided_slice %119 {offsets = [0, 32], sizes = [2, 16], strides = [1, 1]} : vector<2x64xf32> to vector<2x16xf32>
    %131 = vector.extract_strided_slice %119 {offsets = [0, 48], sizes = [2, 16], strides = [1, 1]} : vector<2x64xf32> to vector<2x16xf32>
    %cst_41 = arith.constant 5.000000e-01 : f32
    %132 = vector.broadcast %cst_41 : f32 to vector<2x16xf32>
    %133 = arith.mulf %132, %131 : vector<2x16xf32>
    %cst_42 = arith.constant 5.000000e-01 : f32
    %134 = vector.broadcast %cst_42 : f32 to vector<2x16xf32>
    %135 = arith.addf %133, %134 : vector<2x16xf32>
    %136 = arith.mulf %129, %112 : vector<2x16xf32>
    %137 = arith.mulf %124, %130 : vector<2x16xf32>
    %138 = arith.addf %136, %137 : vector<2x16xf32>
    %139 = math.tanh %138 : vector<2x16xf32>
    %140 = arith.mulf %135, %139 : vector<2x16xf32>
    %141 = vector.extract_strided_slice %8 {offsets = [0, 5, 0], sizes = [2, 1, 64], strides = [1, 1, 1]} : vector<2x8x64xf32> to vector<2x1x64xf32>
    %142 = vector.shape_cast %141 : vector<2x1x64xf32> to vector<2x64xf32>
    %cst_43 = arith.constant dense<0.000000e+00> : vector<2x64xf32>
    %143 = tpu.matmul %140, %1, %cst_43 {dimension_numbers = #tpu.dot_dimension_numbers<[1], [0], [0], [1], [0, 0, 1, 1], [], []>} : vector<2x16xf32>, vector<16x64xf32>, vector<2x64xf32> -> vector<2x64xf32>
    %144 = arith.addf %142, %143 : vector<2x64xf32>
    %145 = math.tanh %144 : vector<2x64xf32>
    %146 = vector.extract_strided_slice %145 {offsets = [0, 0], sizes = [2, 16], strides = [1, 1]} : vector<2x64xf32> to vector<2x16xf32>
    %cst_44 = arith.constant 5.000000e-01 : f32
    %147 = vector.broadcast %cst_44 : f32 to vector<2x16xf32>
    %148 = arith.mulf %147, %146 : vector<2x16xf32>
    %cst_45 = arith.constant 5.000000e-01 : f32
    %149 = vector.broadcast %cst_45 : f32 to vector<2x16xf32>
    %150 = arith.addf %148, %149 : vector<2x16xf32>
    %151 = vector.extract_strided_slice %145 {offsets = [0, 16], sizes = [2, 16], strides = [1, 1]} : vector<2x64xf32> to vector<2x16xf32>
    %cst_46 = arith.constant 5.000000e-01 : f32
    %152 = vector.broadcast %cst_46 : f32 to vector<2x16xf32>
    %153 = arith.mulf %152, %151 : vector<2x16xf32>
    %cst_47 = arith.constant 5.000000e-01 : f32
    %154 = vector.broadcast %cst_47 : f32 to vector<2x16xf32>
    %155 = arith.addf %153, %154 : vector<2x16xf32>
    %156 = vector.extract_strided_slice %145 {offsets = [0, 32], sizes = [2, 16], strides = [1, 1]} : vector<2x64xf32> to vector<2x16xf32>
    %157 = vector.extract_strided_slice %145 {offsets = [0, 48], sizes = [2, 16], strides = [1, 1]} : vector<2x64xf32> to vector<2x16xf32>
    %cst_48 = arith.constant 5.000000e-01 : f32
    %158 = vector.broadcast %cst_48 : f32 to vector<2x16xf32>
    %159 = arith.mulf %158, %157 : vector<2x16xf32>
    %cst_49 = arith.constant 5.000000e-01 : f32
    %160 = vector.broadcast %cst_49 : f32 to vector<2x16xf32>
    %161 = arith.addf %159, %160 : vector<2x16xf32>
    %162 = arith.mulf %155, %138 : vector<2x16xf32>
    %163 = arith.mulf %150, %156 : vector<2x16xf32>
    %164 = arith.addf %162, %163 : vector<2x16xf32>
    %165 = math.tanh %164 : vector<2x16xf32>
    %166 = arith.mulf %161, %165 : vector<2x16xf32>
    %167 = vector.extract_strided_slice %8 {offsets = [0, 6, 0], sizes = [2, 1, 64], strides = [1, 1, 1]} : vector<2x8x64xf32> to vector<2x1x64xf32>
    %168 = vector.shape_cast %167 : vector<2x1x64xf32> to vector<2x64xf32>
    %cst_50 = arith.constant dense<0.000000e+00> : vector<2x64xf32>
    %169 = tpu.matmul %166, %1, %cst_50 {dimension_numbers = #tpu.dot_dimension_numbers<[1], [0], [0], [1], [0, 0, 1, 1], [], []>} : vector<2x16xf32>, vector<16x64xf32>, vector<2x64xf32> -> vector<2x64xf32>
    %170 = arith.addf %168, %169 : vector<2x64xf32>
    %171 = math.tanh %170 : vector<2x64xf32>
    %172 = vector.extract_strided_slice %171 {offsets = [0, 0], sizes = [2, 16], strides = [1, 1]} : vector<2x64xf32> to vector<2x16xf32>
    %cst_51 = arith.constant 5.000000e-01 : f32
    %173 = vector.broadcast %cst_51 : f32 to vector<2x16xf32>
    %174 = arith.mulf %173, %172 : vector<2x16xf32>
    %cst_52 = arith.constant 5.000000e-01 : f32
    %175 = vector.broadcast %cst_52 : f32 to vector<2x16xf32>
    %176 = arith.addf %174, %175 : vector<2x16xf32>
    %177 = vector.extract_strided_slice %171 {offsets = [0, 16], sizes = [2, 16], strides = [1, 1]} : vector<2x64xf32> to vector<2x16xf32>
    %cst_53 = arith.constant 5.000000e-01 : f32
    %178 = vector.broadcast %cst_53 : f32 to vector<2x16xf32>
    %179 = arith.mulf %178, %177 : vector<2x16xf32>
    %cst_54 = arith.constant 5.000000e-01 : f32
    %180 = vector.broadcast %cst_54 : f32 to vector<2x16xf32>
    %181 = arith.addf %179, %180 : vector<2x16xf32>
    %182 = vector.extract_strided_slice %171 {offsets = [0, 32], sizes = [2, 16], strides = [1, 1]} : vector<2x64xf32> to vector<2x16xf32>
    %183 = vector.extract_strided_slice %171 {offsets = [0, 48], sizes = [2, 16], strides = [1, 1]} : vector<2x64xf32> to vector<2x16xf32>
    %cst_55 = arith.constant 5.000000e-01 : f32
    %184 = vector.broadcast %cst_55 : f32 to vector<2x16xf32>
    %185 = arith.mulf %184, %183 : vector<2x16xf32>
    %cst_56 = arith.constant 5.000000e-01 : f32
    %186 = vector.broadcast %cst_56 : f32 to vector<2x16xf32>
    %187 = arith.addf %185, %186 : vector<2x16xf32>
    %188 = arith.mulf %181, %164 : vector<2x16xf32>
    %189 = arith.mulf %176, %182 : vector<2x16xf32>
    %190 = arith.addf %188, %189 : vector<2x16xf32>
    %191 = math.tanh %190 : vector<2x16xf32>
    %192 = arith.mulf %187, %191 : vector<2x16xf32>
    %193 = vector.extract_strided_slice %8 {offsets = [0, 7, 0], sizes = [2, 1, 64], strides = [1, 1, 1]} : vector<2x8x64xf32> to vector<2x1x64xf32>
    %194 = vector.shape_cast %193 : vector<2x1x64xf32> to vector<2x64xf32>
    %cst_57 = arith.constant dense<0.000000e+00> : vector<2x64xf32>
    %195 = tpu.matmul %192, %1, %cst_57 {dimension_numbers = #tpu.dot_dimension_numbers<[1], [0], [0], [1], [0, 0, 1, 1], [], []>} : vector<2x16xf32>, vector<16x64xf32>, vector<2x64xf32> -> vector<2x64xf32>
    %196 = arith.addf %194, %195 : vector<2x64xf32>
    %197 = math.tanh %196 : vector<2x64xf32>
    %198 = vector.extract_strided_slice %197 {offsets = [0, 0], sizes = [2, 16], strides = [1, 1]} : vector<2x64xf32> to vector<2x16xf32>
    %cst_58 = arith.constant 5.000000e-01 : f32
    %199 = vector.broadcast %cst_58 : f32 to vector<2x16xf32>
    %200 = arith.mulf %199, %198 : vector<2x16xf32>
    %cst_59 = arith.constant 5.000000e-01 : f32
    %201 = vector.broadcast %cst_59 : f32 to vector<2x16xf32>
    %202 = arith.addf %200, %201 : vector<2x16xf32>
    %203 = vector.extract_strided_slice %197 {offsets = [0, 16], sizes = [2, 16], strides = [1, 1]} : vector<2x64xf32> to vector<2x16xf32>
    %cst_60 = arith.constant 5.000000e-01 : f32
    %204 = vector.broadcast %cst_60 : f32 to vector<2x16xf32>
    %205 = arith.mulf %204, %203 : vector<2x16xf32>
    %cst_61 = arith.constant 5.000000e-01 : f32
    %206 = vector.broadcast %cst_61 : f32 to vector<2x16xf32>
    %207 = arith.addf %205, %206 : vector<2x16xf32>
    %208 = vector.extract_strided_slice %197 {offsets = [0, 32], sizes = [2, 16], strides = [1, 1]} : vector<2x64xf32> to vector<2x16xf32>
    %209 = vector.extract_strided_slice %197 {offsets = [0, 48], sizes = [2, 16], strides = [1, 1]} : vector<2x64xf32> to vector<2x16xf32>
    %cst_62 = arith.constant 5.000000e-01 : f32
    %210 = vector.broadcast %cst_62 : f32 to vector<2x16xf32>
    %211 = arith.mulf %210, %209 : vector<2x16xf32>
    %cst_63 = arith.constant 5.000000e-01 : f32
    %212 = vector.broadcast %cst_63 : f32 to vector<2x16xf32>
    %213 = arith.addf %211, %212 : vector<2x16xf32>
    %214 = arith.mulf %207, %190 : vector<2x16xf32>
    %215 = arith.mulf %202, %208 : vector<2x16xf32>
    %216 = arith.addf %214, %215 : vector<2x16xf32>
    %217 = math.tanh %216 : vector<2x16xf32>
    %218 = arith.mulf %213, %217 : vector<2x16xf32>
    %c0_64 = arith.constant 0 : index
    %c0_65 = arith.constant 0 : index
    %219 = vector.load %arg2[%c0_64, %c0_65] : memref<24x3xf32, #tpu.memory_space<vmem>>, vector<16x3xf32>
    %c16 = arith.constant 16 : index
    %c0_66 = arith.constant 0 : index
    %220 = vector.load %arg2[%c16, %c0_66] : memref<24x3xf32, #tpu.memory_space<vmem>>, vector<1x3xf32>
    %cst_67 = arith.constant dense<0.000000e+00> : vector<2x3xf32>
    %221 = tpu.matmul %218, %219, %cst_67 {dimension_numbers = #tpu.dot_dimension_numbers<[1], [0], [0], [1], [0, 0, 1, 1], [], []>} : vector<2x16xf32>, vector<16x3xf32>, vector<2x3xf32> -> vector<2x3xf32>
    %222 = vector.broadcast %220 : vector<1x3xf32> to vector<2x3xf32>
    %223 = arith.addf %221, %222 : vector<2x3xf32>
    %c0_68 = arith.constant 0 : index
    %c0_69 = arith.constant 0 : index
    %224 = vector.load %arg3[%c0_68, %c0_69] : memref<2x3xf32, #tpu.memory_space<vmem>>, vector<2x3xf32>
    tpu.vector_store %arg3[%c0_68, %c0_69], %223 {strides = array<i32>} : memref<2x3xf32, #tpu.memory_space<vmem>>, vector<2x3xf32>,
    return
  }
}

</mosaic_0001>

<bundles_post_ra>
// kernel: rnn_forward.1
= control target key start
LH: loop header
LB: loop body
LE: loop exit
PB: predicated region body
PF: predicated region fallthrough
CT: control target
= control target key end

     0   :  { %vm29_vm0 = vcmask 1043456   ;;  %vm22_vm1 = vcmask 31744   ;;  %s1008_s0 = inlined_call_operand.vmem [shape: f32[2,8,4], index: 0, kind: input, shape index: {}]   ;;  %s1009_s1 = inlined_call_operand.vmem [shape: f32[32,64], index: 1, kind: input, shape index: {}]   ;;  %s1010_s2 = inlined_call_operand.vmem [shape: f32[24,3], index: 2, kind: input, shape index: {}]   ;;  %s1011_s3 = inlined_call_operand.hbm [shape: f32[2,3], index: 3, kind: output, shape index: {}]  }
   0x1   :  { %v15_v0 = vld [vmem:[%s1009_s1] sm:$0xf]  ;;  %v17_v1 = vld [vmem:[%s1009_s1 + $0x10] sm:$0xff]  ;;  %v16_v3 = vld [vmem:[%s1009_s1 + $0x8] sm:$0xff] }
   0x2   :  { %v19_v2 = vld [vmem:[%s1008_s0] sm:$0xff]  ;;  %749 = vmatpush.msk.msra.mxu0 %vm29_vm0, %v15_v0  ;;  %74 = vmatpush.msra.mxu1 %v17_v1 }
   0x3   :  { %750 = vmatmul.msk.f32.vlgmr.msra.gmra.mxu0 %vm22_vm1, %v19_v2  ;;  %149 = vmatpush.msra.mxu2 %v17_v1 }
   0x4   :  { %8 = vsyncpa [#allocation3], 0  ;;  %75 = vmatpush.msra.mxu1 %v16_v3  ;;  %229 = vmatpush.msra.mxu3 %v17_v1  ;;  %v858_v4 = vmov 0.0   ;;  %v20_v5 = vld [vmem:[%s1008_s0 + $0x8] sm:$0xff]  ;;  %v766_v8 = vld [vmem:[%s1009_s1 + $0x18] ss:$0 sm:$0xff] }
   0x5   :  { %76 = vmatmul.f32.vlgmr.msra.gmra.mxu1 %v858_v4  ;;  %150 = vmatpush.msra.mxu2 %v16_v3  ;;  %s859_s0 = smov 96   ;;  %s860_s1 = smov 16   ;;  %vm129_vm2 = vcmask 1041409   ;;  %vm56_vm3 = vcmask 130048   ;;  %vm731_vm4 = vcmask 17408  }
   0x6   :  { %230 = vmatpush.msra.mxu3 %v16_v3  ;;  %311 = vmatpush.msrb.mxu1 %v17_v1  ;;  %s861_s24 = smov 32   ;;  %s862_s25 = smov 80  }
   0x7   :  { %393 = vmatpush.msrb.mxu2 %v17_v1  ;;  %557 = vmatpush.msrb.mxu0 %v17_v1  ;;  %s863_s5 = smov [#allocation2]   ;;  %s740_s9 = sshll.u32 %s1011_s3, 4  ;;  %s741_s9 = int_to_ptr.hbm [resolvable:$true] %s740_s9 }
   0x8   :  { %475 = vmatpush.msrb.mxu3 %v17_v1  ;;  %312 = vmatpush.msrb.mxu1 %v16_v3  ;;  %s738_s6 = sshll.u32 %s863_s5, 4  ;;  %s739_s6 = int_to_ptr.vmem [resolvable:$true] %s738_s6 }
   0x9   :  { %394 = vmatpush.msrb.mxu2 %v16_v3  ;;  %558 = vmatpush.msrb.mxu0 %v16_v3 }
   0xa   :  { %476 = vmatpush.msrb.mxu3 %v16_v3  ;;  %639 = vmatpush.msra.mxu1 %v17_v1 }
   0xb   :  { %751 = vmatmul.msk.f32.gmra.mxu0 %vm22_vm1, %v20_v5 }
   0xc   :  { %640 = vmatpush.msra.mxu1 %v16_v3 }
  0x80   :  { %v50_v6 = vpop.f32.mrf.mxu0 }
  0x81   :  { %v907_v13 = vadd.f32 %v766_v8, %v50_v6 }
  0x82   :  { %v77_v7 = vpop.f32.mrf.mxu1 }
  0x83   :  { %v81_v9 = vrot.slane %v77_v7, 1  ;;  %v84_v14 = vadd.f32 %v77_v7, %v907_v13 }
  0x88   :  { %v53_v10 = vpop.f32.mrf.mxu0 }
  0x89   :  { %v904_v11 = vadd.f32 %v766_v8, %v53_v10 }
  0x8b   :  { %v85_v12 = vadd.f32 %v81_v9, %v904_v11 }
  0x8d   :  { %768 = vtanh.f32 %v85_v12 }
  0x8e   :  { %770 = vtanh.f32 %v84_v14 }
  0x93   :  { %v769_v15 = vpop.eup %768 }
  0x94   :  { %98 = vrot.lane.b32.xlu0 %v769_v15, %s859_s0  ;;  %v771_v16 = vpop.eup %770  ;;  %v89_v17 = vmul.f32 0.5, %v769_v15 }
  0x95   :  { %v88_v21 = vmul.f32 0.5, %v771_v16 }
  0x96   :  { %v91_v18 = vadd.f32 0.5, %v89_v17 }
  0x97   :  { %v90_v22 = vadd.f32 0.5, %v88_v21 }
  0x98   :  { %v93_v25 = vmul.f32 0.0, %v91_v18 }
  0x99   :  { %v92_v28 = vmul.f32 0.0, %v90_v22 }
  0x9c   :  { %96 = vrot.lane.b32.xlu0 %v771_v16, %s859_s0 }
 0x106   :  { %v99_v19 = vpop.permute.xlu0 %98 }
 0x107   :  { %v103_v20 = vmul.f32 %v99_v19, %v91_v18 }
 0x109   :  { %108 = vrot.lane.b32.xlu1 %v103_v20, %s860_s1 }
 0x10e   :  { %v97_v23 = vpop.permute.xlu0 %96 }
 0x10f   :  { %v102_v24 = vmul.f32 %v97_v23, %v90_v22 }
 0x111   :  { %106 = vrot.lane.b32.xlu1 %v102_v24, %s860_s1 }
 0x17b   :  { %v109_v26 = vpop.permute.xlu1 %108 }
 0x17c   :  { %v113_v27 = vadd.f32 %v109_v26, %v93_v25 }
 0x17e   :  { %772 = vtanh.f32 %v113_v27  ;;  %v170_v54 = vrot.slane %v113_v27, 7 }
 0x183   :  { %v107_v29 = vpop.permute.xlu1 %106 }
 0x184   :  { %v773_v30 = vpop.eup %772  ;;  %v112_v31 = vadd.f32 %v107_v29, %v92_v28 }
 0x185   :  { %120 = vrot.lane.b32.xlu2 %v773_v30, %s861_s24 }
 0x186   :  { %774 = vtanh.f32 %v112_v31  ;;  %v169_v59 = vrot.slane %v112_v31, 7 }
 0x18c   :  { %v775_v32 = vpop.eup %774 }
 0x18d   :  { %118 = vrot.lane.b32.xlu2 %v775_v32, %s861_s24 }
 0x1df   :  { %v121_v33 = vpop.permute.xlu2 %120 }
 0x1e0   :  { %v125_v34 = vmul.f32 %v121_v33, %v91_v18 }
 0x1e2   :  { %v128_v36 = vrot.slane %v125_v34, 7 }
 0x1e7   :  { %v119_v35 = vpop.permute.xlu2 %118 }
 0x1e8   :  { %v124_v37 = vmul.f32 %v119_v35, %v90_v22 }
 0x1ea   :  { %v130_v38 = vsel %vm129_vm2, %v128_v36, %v124_v37 }
 0x1eb   :  { %131 = vrot.lane.b32.xlu0 %v130_v38, %s862_s25 }
 0x25d   :  { %v132_v39 = vpop.permute.xlu0 %131 }
 0x25e   :  { %752 = vmatmul.msk.f32.vlgmr.msra.gmra.mxu2 %vm56_vm3, %v132_v39 }
 0x2e1   :  { %v152_v40 = vpop.f32.mrf.mxu2 }
 0x2e2   :  { %v156_v41 = vrot.slane %v152_v40, 7  ;;  %v160_v42 = vadd.f32 %v152_v40, %v904_v11 }
 0x2e4   :  { %v159_v43 = vadd.f32 %v156_v41, %v907_v13  ;;  %776 = vtanh.f32 %v160_v42 }
 0x2e6   :  { %778 = vtanh.f32 %v159_v43 }
 0x2ea   :  { %v777_v44 = vpop.eup %776 }
 0x2eb   :  { %179 = vrot.lane.b32.xlu2 %v777_v44, %s859_s0  ;;  %v164_v46 = vmul.f32 0.5, %v777_v44 }
 0x2ec   :  { %v779_v45 = vpop.eup %778 }
 0x2ed   :  { %177 = vrot.lane.b32.xlu1 %v779_v45, %s859_s0  ;;  %v166_v47 = vadd.f32 0.5, %v164_v46  ;;  %v163_v50 = vmul.f32 0.5, %v779_v45 }
 0x2ef   :  { %v165_v51 = vadd.f32 0.5, %v163_v50  ;;  %v174_v55 = vmul.f32 %v170_v54, %v166_v47 }
 0x2f1   :  { %v173_v60 = vmul.f32 %v169_v59, %v165_v51 }
 0x345   :  { %v180_v48 = vpop.permute.xlu2 %179 }
 0x346   :  { %v184_v49 = vmul.f32 %v180_v48, %v166_v47 }
 0x348   :  { %189 = vrot.lane.b32.xlu1 %v184_v49, %s860_s1 }
 0x35f   :  { %v178_v52 = vpop.permute.xlu1 %177 }
 0x360   :  { %v183_v53 = vmul.f32 %v178_v52, %v165_v51 }
 0x362   :  { %187 = vrot.lane.b32.xlu0 %v183_v53, %s860_s1 }
 0x3ba   :  { %v190_v56 = vpop.permute.xlu1 %189 }
 0x3bb   :  { %v194_v57 = vadd.f32 %v190_v56, %v174_v55 }
 0x3bd   :  { %780 = vtanh.f32 %v194_v57  ;;  %v251_v25 = vrot.slane %v194_v57, 7 }
 0x3c3   :  { %v781_v58 = vpop.eup %780 }
 0x3c4   :  { %201 = vrot.lane.b32.xlu0 %v781_v58, %s861_s24 }
 0x3d4   :  { %v188_v61 = vpop.permute.xlu0 %187 }
 0x3d5   :  { %v193_v62 = vadd.f32 %v188_v61, %v173_v60 }
 0x3d7   :  { %782 = vtanh.f32 %v193_v62  ;;  %v250_v24 = vrot.slane %v193_v62, 7 }
 0x3dd   :  { %v783_v63 = vpop.eup %782 }
 0x3de   :  { %199 = vrot.lane.b32.xlu2 %v783_v63, %s861_s24 }
 0x436   :  { %v202_v0 = vpop.permute.xlu0 %201 }
 0x437   :  { %v206_v3 = vmul.f32 %v202_v0, %v166_v47 }
 0x438   :  { %v200_v1 = vpop.permute.xlu2 %199 }
 0x439   :  { %v205_v2 = vmul.f32 %v200_v1, %v165_v51 }
 0x43b   :  { %v209_v4 = vrot.slane %v205_v2, 1 }
 0x43d   :  { %v210_v5 = vsel %vm129_vm2, %v206_v3, %v209_v4 }
 0x43e   :  { %211 = vrot.lane.b32.xlu1 %v210_v5, %s862_s25 }
 0x4b0   :  { %v212_v6 = vpop.permute.xlu1 %211 }
 0x4b1   :  { %753 = vmatmul.msk.f32.vlgmr.msra.gmra.mxu3 %vm56_vm3, %v212_v6 }
 0x534   :  { %v232_v7 = vpop.f32.mrf.mxu3 }
 0x535   :  { %v236_v8 = vrot.slane %v232_v7, 6  ;;  %v237_v9 = vrot.slane %v232_v7, 7 }
 0x537   :  { %v240_v10 = vadd.f32 %v236_v8, %v907_v13  ;;  %v241_v12 = vadd.f32 %v237_v9, %v904_v11 }
 0x539   :  { %784 = vtanh.f32 %v240_v10 }
 0x53a   :  { %786 = vtanh.f32 %v241_v12 }
 0x53f   :  { %v785_v14 = vpop.eup %784 }
 0x540   :  { %v787_v15 = vpop.eup %786  ;;  %258 = vrot.lane.b32.xlu2 %v785_v14, %s859_s0  ;;  %v244_v16 = vmul.f32 0.5, %v785_v14 }
 0x541   :  { %260 = vrot.lane.b32.xlu0 %v787_v15, %s859_s0  ;;  %v245_v20 = vmul.f32 0.5, %v787_v15 }
 0x542   :  { %v246_v17 = vadd.f32 0.5, %v244_v16 }
 0x543   :  { %v247_v21 = vadd.f32 0.5, %v245_v20 }
 0x544   :  { %v254_v26 = vmul.f32 %v250_v24, %v246_v17 }
 0x545   :  { %v255_v27 = vmul.f32 %v251_v25, %v247_v21 }
 0x59a   :  { %v259_v18 = vpop.permute.xlu2 %258 }
 0x59b   :  { %v264_v19 = vmul.f32 %v259_v18, %v246_v17 }
 0x59d   :  { %268 = vrot.lane.b32.xlu1 %v264_v19, %s860_s1 }
 0x5b3   :  { %v261_v22 = vpop.permute.xlu0 %260 }
 0x5b4   :  { %v265_v23 = vmul.f32 %v261_v22, %v247_v21 }
 0x5b6   :  { %270 = vrot.lane.b32.xlu2 %v265_v23, %s860_s1 }
 0x60f   :  { %v269_v28 = vpop.permute.xlu1 %268 }
 0x610   :  { %v271_v29 = vpop.permute.xlu2 %270  ;;  %v274_v30 = vadd.f32 %v269_v28, %v254_v26 }
 0x611   :  { %v275_v31 = vadd.f32 %v271_v29, %v255_v27 }
 0x612   :  { %788 = vtanh.f32 %v274_v30  ;;  %v332_v57 = vrot.slane %v274_v30, 7 }
 0x613   :  { %790 = vtanh.f32 %v275_v31  ;;  %v333_v62 = vrot.slane %v275_v31, 7 }
 0x618   :  { %v789_v32 = vpop.eup %788 }
 0x619   :  { %v791_v33 = vpop.eup %790  ;;  %280 = vrot.lane.b32.xlu0 %v789_v32, %s861_s24 }
 0x61a   :  { %282 = vrot.lane.b32.xlu1 %v791_v33, %s861_s24 }
 0x68b   :  { %v281_v34 = vpop.permute.xlu0 %280 }
 0x68c   :  { %v283_v35 = vpop.permute.xlu1 %282  ;;  %v286_v36 = vmul.f32 %v281_v34, %v246_v17 }
 0x68d   :  { %v287_v37 = vmul.f32 %v283_v35, %v247_v21 }
 0x68e   :  { %v290_v38 = vrot.slane %v286_v36, 2 }
 0x68f   :  { %v291_v39 = vrot.slane %v287_v37, 1 }
 0x691   :  { %v292_v40 = vsel %vm129_vm2, %v291_v39, %v290_v38 }
 0x692   :  { %293 = vrot.lane.b32.xlu2 %v292_v40, %s862_s25 }
 0x6ec   :  { %v294_v41 = vpop.permute.xlu2 %293 }
 0x6ed   :  { %754 = vmatmul.msk.f32.vlgmr.msrb.gmra.mxu1 %vm56_vm3, %v294_v41 }
 0x76a   :  { %v314_v42 = vpop.f32.mrf.mxu1 }
 0x76b   :  { %v318_v43 = vrot.slane %v314_v42, 5  ;;  %v319_v44 = vrot.slane %v314_v42, 6 }
 0x76d   :  { %v322_v45 = vadd.f32 %v318_v43, %v907_v13  ;;  %v323_v46 = vadd.f32 %v319_v44, %v904_v11 }
 0x76f   :  { %792 = vtanh.f32 %v322_v45 }
 0x770   :  { %794 = vtanh.f32 %v323_v46 }
 0x775   :  { %v793_v47 = vpop.eup %792 }
 0x776   :  { %v795_v48 = vpop.eup %794  ;;  %340 = vrot.lane.b32.xlu0 %v793_v47, %s859_s0  ;;  %v326_v49 = vmul.f32 0.5, %v793_v47 }
 0x777   :  { %342 = vrot.lane.b32.xlu1 %v795_v48, %s859_s0  ;;  %v327_v50 = vmul.f32 0.5, %v795_v48 }
 0x778   :  { %v328_v51 = vadd.f32 0.5, %v326_v49 }
 0x779   :  { %v329_v52 = vadd.f32 0.5, %v327_v50 }
 0x77a   :  { %v336_v58 = vmul.f32 %v332_v57, %v328_v51 }
 0x77b   :  { %v337_v63 = vmul.f32 %v333_v62, %v329_v52 }
 0x7e8   :  { %v341_v53 = vpop.permute.xlu0 %340 }
 0x7e9   :  { %v343_v54 = vpop.permute.xlu1 %342  ;;  %v346_v55 = vmul.f32 %v341_v53, %v328_v51 }
 0x7ea   :  { %v347_v56 = vmul.f32 %v343_v54, %v329_v52 }
 0x7eb   :  { %350 = vrot.lane.b32.xlu2 %v346_v55, %s860_s1 }
 0x7ec   :  { %352 = vrot.lane.b32.xlu0 %v347_v56, %s860_s1 }
 0x845   :  { %v351_v59 = vpop.permute.xlu2 %350 }
 0x846   :  { %v356_v60 = vadd.f32 %v351_v59, %v336_v58 }
 0x848   :  { %796 = vtanh.f32 %v356_v60  ;;  %v414_v33 = vrot.slane %v356_v60, 7 }
 0x84e   :  { %v797_v61 = vpop.eup %796 }
 0x84f   :  { %362 = vrot.lane.b32.xlu1 %v797_v61, %s861_s24 }
 0x85e   :  { %v353_v0 = vpop.permute.xlu0 %352 }
 0x85f   :  { %v357_v1 = vadd.f32 %v353_v0, %v337_v63 }
 0x861   :  { %798 = vtanh.f32 %v357_v1  ;;  %v415_v28 = vrot.slane %v357_v1, 7 }
 0x867   :  { %v799_v2 = vpop.eup %798 }
 0x868   :  { %364 = vrot.lane.b32.xlu2 %v799_v2, %s861_s24 }
 0x8c1   :  { %v363_v3 = vpop.permute.xlu1 %362 }
 0x8c2   :  { %v365_v4 = vpop.permute.xlu2 %364  ;;  %v368_v5 = vmul.f32 %v363_v3, %v328_v51 }
 0x8c3   :  { %v369_v6 = vmul.f32 %v365_v4, %v329_v52 }
 0x8c4   :  { %v372_v7 = vrot.slane %v368_v5, 3 }
 0x8c5   :  { %v373_v8 = vrot.slane %v369_v6, 2 }
 0x8c7   :  { %v374_v9 = vsel %vm129_vm2, %v373_v8, %v372_v7 }
 0x8c8   :  { %375 = vrot.lane.b32.xlu0 %v374_v9, %s862_s25 }
 0x93a   :  { %v376_v10 = vpop.permute.xlu0 %375 }
 0x93b   :  { %755 = vmatmul.msk.f32.vlgmr.msrb.gmra.mxu2 %vm56_vm3, %v376_v10 }
 0x9be   :  { %v396_v12 = vpop.f32.mrf.mxu2 }
 0x9bf   :  { %v400_v14 = vrot.slane %v396_v12, 4  ;;  %v401_v15 = vrot.slane %v396_v12, 5 }
 0x9c1   :  { %v404_v16 = vadd.f32 %v400_v14, %v907_v13  ;;  %v405_v17 = vadd.f32 %v401_v15, %v904_v11 }
 0x9c3   :  { %800 = vtanh.f32 %v404_v16 }
 0x9c4   :  { %802 = vtanh.f32 %v405_v17 }
 0x9c9   :  { %v801_v18 = vpop.eup %800 }
 0x9ca   :  { %v803_v19 = vpop.eup %802  ;;  %422 = vrot.lane.b32.xlu1 %v801_v18, %s859_s0  ;;  %v408_v24 = vmul.f32 0.5, %v801_v18 }
 0x9cb   :  { %424 = vrot.lane.b32.xlu2 %v803_v19, %s859_s0  ;;  %v409_v20 = vmul.f32 0.5, %v803_v19 }
 0x9cc   :  { %v410_v25 = vadd.f32 0.5, %v408_v24 }
 0x9cd   :  { %v411_v21 = vadd.f32 0.5, %v409_v20 }
 0x9ce   :  { %v418_v34 = vmul.f32 %v414_v33, %v410_v25 }
 0x9cf   :  { %v419_v29 = vmul.f32 %v415_v28, %v411_v21 }
 0xa25   :  { %v425_v22 = vpop.permute.xlu2 %424 }
 0xa26   :  { %v429_v23 = vmul.f32 %v425_v22, %v411_v21 }
 0xa28   :  { %434 = vrot.lane.b32.xlu1 %v429_v23, %s860_s1 }
 0xa3c   :  { %v423_v26 = vpop.permute.xlu1 %422 }
 0xa3d   :  { %v428_v27 = vmul.f32 %v423_v26, %v410_v25 }
 0xa3f   :  { %432 = vrot.lane.b32.xlu0 %v428_v27, %s860_s1 }
 0xa9a   :  { %v435_v30 = vpop.permute.xlu1 %434 }
 0xa9b   :  { %v439_v31 = vadd.f32 %v435_v30, %v419_v29 }
 0xa9d   :  { %804 = vtanh.f32 %v439_v31  ;;  %v497_v62 = vrot.slane %v439_v31, 7 }
 0xaa3   :  { %v805_v32 = vpop.eup %804 }
 0xaa4   :  { %446 = vrot.lane.b32.xlu0 %v805_v32, %s861_s24 }
 0xab1   :  { %v433_v35 = vpop.permute.xlu0 %432 }
 0xab2   :  { %v438_v36 = vadd.f32 %v433_v35, %v418_v34 }
 0xab4   :  { %806 = vtanh.f32 %v438_v36  ;;  %v496_v61 = vrot.slane %v438_v36, 7 }
 0xaba   :  { %v807_v37 = vpop.eup %806 }
 0xabb   :  { %444 = vrot.lane.b32.xlu2 %v807_v37, %s861_s24 }
 0xb15   :  { %v445_v38 = vpop.permute.xlu2 %444 }
 0xb16   :  { %v447_v39 = vpop.permute.xlu0 %446  ;;  %v450_v40 = vmul.f32 %v445_v38, %v410_v25 }
 0xb17   :  { %v451_v41 = vmul.f32 %v447_v39, %v411_v21 }
 0xb18   :  { %v454_v42 = vrot.slane %v450_v40, 4 }
 0xb19   :  { %v455_v43 = vrot.slane %v451_v41, 3 }
 0xb1b   :  { %v456_v44 = vsel %vm129_vm2, %v455_v43, %v454_v42 }
 0xb1c   :  { %457 = vrot.lane.b32.xlu1 %v456_v44, %s862_s25 }
 0xb8e   :  { %v458_v45 = vpop.permute.xlu1 %457 }
 0xb8f   :  { %756 = vmatmul.msk.f32.vlgmr.msrb.gmra.mxu3 %vm56_vm3, %v458_v45 }
 0xc12   :  { %v478_v46 = vpop.f32.mrf.mxu3 }
 0xc13   :  { %v482_v47 = vrot.slane %v478_v46, 3  ;;  %v483_v48 = vrot.slane %v478_v46, 4 }
 0xc15   :  { %v486_v49 = vadd.f32 %v482_v47, %v907_v13  ;;  %v487_v50 = vadd.f32 %v483_v48, %v904_v11 }
 0xc17   :  { %808 = vtanh.f32 %v486_v49 }
 0xc18   :  { %810 = vtanh.f32 %v487_v50 }
 0xc1d   :  { %v809_v51 = vpop.eup %808 }
 0xc1e   :  { %v811_v52 = vpop.eup %810  ;;  %504 = vrot.lane.b32.xlu2 %v809_v51, %s859_s0  ;;  %v490_v53 = vmul.f32 0.5, %v809_v51 }
 0xc1f   :  { %506 = vrot.lane.b32.xlu0 %v811_v52, %s859_s0  ;;  %v491_v57 = vmul.f32 0.5, %v811_v52 }
 0xc20   :  { %v492_v54 = vadd.f32 0.5, %v490_v53 }
 0xc21   :  { %v493_v58 = vadd.f32 0.5, %v491_v57 }
 0xc22   :  { %v500_v63 = vmul.f32 %v496_v61, %v492_v54 }
 0xc23   :  { %v501_v0 = vmul.f32 %v497_v62, %v493_v58 }
 0xc78   :  { %v505_v55 = vpop.permute.xlu2 %504 }
 0xc79   :  { %v510_v56 = vmul.f32 %v505_v55, %v492_v54 }
 0xc7b   :  { %514 = vrot.lane.b32.xlu1 %v510_v56, %s860_s1 }
 0xc91   :  { %v507_v59 = vpop.permute.xlu0 %506 }
 0xc92   :  { %v511_v60 = vmul.f32 %v507_v59, %v493_v58 }
 0xc94   :  { %516 = vrot.lane.b32.xlu2 %v511_v60, %s860_s1 }
 0xced   :  { %v515_v1 = vpop.permute.xlu1 %514 }
 0xcee   :  { %v517_v2 = vpop.permute.xlu2 %516  ;;  %v520_v3 = vadd.f32 %v515_v1, %v500_v63 }
 0xcef   :  { %v521_v4 = vadd.f32 %v517_v2, %v501_v0 }
 0xcf0   :  { %812 = vtanh.f32 %v520_v3  ;;  %v578_v32 = vrot.slane %v520_v3, 7 }
 0xcf1   :  { %814 = vtanh.f32 %v521_v4  ;;  %v579_v37 = vrot.slane %v521_v4, 7 }
 0xcf6   :  { %v813_v5 = vpop.eup %812 }
 0xcf7   :  { %v815_v6 = vpop.eup %814  ;;  %526 = vrot.lane.b32.xlu0 %v813_v5, %s861_s24 }
 0xcf8   :  { %528 = vrot.lane.b32.xlu1 %v815_v6, %s861_s24 }
 0xd69   :  { %v527_v7 = vpop.permute.xlu0 %526 }
 0xd6a   :  { %v529_v8 = vpop.permute.xlu1 %528  ;;  %v532_v9 = vmul.f32 %v527_v7, %v492_v54 }
 0xd6b   :  { %v533_v10 = vmul.f32 %v529_v8, %v493_v58 }
 0xd6c   :  { %v536_v12 = vrot.slane %v532_v9, 5  ;;  %v699_v9 = vld [vmem:[%s1010_s2 + $0x8] sm:$0xff] }
 0xd6d   :  { %v537_v14 = vrot.slane %v533_v10, 4  ;;  %v698_v10 = vld [vmem:[%s1010_s2] sm:$0xff]  ;;  %725 = vmatpush.msra.mxu2 %v699_v9 }
 0xd6f   :  { %v538_v15 = vsel %vm129_vm2, %v537_v14, %v536_v12  ;;  %726 = vmatpush.msra.mxu2 %v698_v10 }
 0xd70   :  { %539 = vrot.lane.b32.xlu2 %v538_v15, %s862_s25 }
 0xdca   :  { %v540_v16 = vpop.permute.xlu2 %539 }
 0xdcb   :  { %757 = vmatmul.msk.f32.vlgmr.msrb.gmra.mxu0 %vm56_vm3, %v540_v16 }
 0xe48   :  { %v560_v17 = vpop.f32.mrf.mxu0 }
 0xe49   :  { %v564_v18 = vrot.slane %v560_v17, 2  ;;  %v565_v19 = vrot.slane %v560_v17, 3 }
 0xe4b   :  { %v568_v20 = vadd.f32 %v564_v18, %v907_v13  ;;  %v569_v21 = vadd.f32 %v565_v19, %v904_v11 }
 0xe4d   :  { %816 = vtanh.f32 %v568_v20 }
 0xe4e   :  { %818 = vtanh.f32 %v569_v21  ;;  %v767_v21 = vld [vmem:[%s1010_s2 + $0x10] ss:$0 sm:$0xff] }
 0xe53   :  { %v817_v22 = vpop.eup %816 }
 0xe54   :  { %v819_v23 = vpop.eup %818  ;;  %586 = vrot.lane.b32.xlu0 %v817_v22, %s859_s0  ;;  %v572_v24 = vmul.f32 0.5, %v817_v22 }
 0xe55   :  { %588 = vrot.lane.b32.xlu1 %v819_v23, %s859_s0  ;;  %v573_v25 = vmul.f32 0.5, %v819_v23 }
 0xe56   :  { %v574_v26 = vadd.f32 0.5, %v572_v24 }
 0xe57   :  { %v575_v27 = vadd.f32 0.5, %v573_v25 }
 0xe58   :  { %v582_v33 = vmul.f32 %v578_v32, %v574_v26 }
 0xe59   :  { %v583_v38 = vmul.f32 %v579_v37, %v575_v27 }
 0xec6   :  { %v587_v28 = vpop.permute.xlu0 %586 }
 0xec7   :  { %v589_v29 = vpop.permute.xlu1 %588  ;;  %v592_v30 = vmul.f32 %v587_v28, %v574_v26 }
 0xec8   :  { %v593_v31 = vmul.f32 %v589_v29, %v575_v27 }
 0xec9   :  { %596 = vrot.lane.b32.xlu2 %v592_v30, %s860_s1 }
 0xeca   :  { %598 = vrot.lane.b32.xlu0 %v593_v31, %s860_s1 }
 0xf23   :  { %v597_v34 = vpop.permute.xlu2 %596 }
 0xf24   :  { %v602_v35 = vadd.f32 %v597_v34, %v582_v33 }
 0xf26   :  { %820 = vtanh.f32 %v602_v35  ;;  %v660_v4 = vrot.slane %v602_v35, 7 }
 0xf2c   :  { %v821_v36 = vpop.eup %820 }
 0xf2d   :  { %608 = vrot.lane.b32.xlu1 %v821_v36, %s861_s24 }
 0xf3c   :  { %v599_v39 = vpop.permute.xlu0 %598 }
 0xf3d   :  { %v603_v40 = vadd.f32 %v599_v39, %v583_v38 }
 0xf3f   :  { %822 = vtanh.f32 %v603_v40 }
 0xf45   :  { %v823_v41 = vpop.eup %822 }
 0xf46   :  { %610 = vrot.lane.b32.xlu2 %v823_v41, %s861_s24 }
 0xf9f   :  { %v609_v42 = vpop.permute.xlu1 %608 }
 0xfa0   :  { %v611_v43 = vpop.permute.xlu2 %610  ;;  %v614_v44 = vmul.f32 %v609_v42, %v574_v26 }
 0xfa1   :  { %v615_v45 = vmul.f32 %v611_v43, %v575_v27 }
 0xfa2   :  { %v618_v46 = vrot.slane %v614_v44, 6 }
 0xfa3   :  { %v619_v47 = vrot.slane %v615_v45, 5 }
 0xfa5   :  { %v620_v48 = vsel %vm129_vm2, %v619_v47, %v618_v46 }
 0xfa6   :  { %621 = vrot.lane.b32.xlu0 %v620_v48, %s862_s25 }
0x1018   :  { %v622_v49 = vpop.permute.xlu0 %621 }
0x1019   :  { %758 = vmatmul.msk.f32.vlgmr.msra.gmra.mxu1 %vm56_vm3, %v622_v49 }
0x1096   :  { %v642_v50 = vpop.f32.mrf.mxu1 }
0x1097   :  { %v646_v51 = vrot.slane %v642_v50, 1  ;;  %v647_v52 = vrot.slane %v642_v50, 2 }
0x1099   :  { %v650_v53 = vadd.f32 %v646_v51, %v907_v13  ;;  %v651_v54 = vadd.f32 %v647_v52, %v904_v11  ;;  %v661_v11 = vrot.slane %v603_v40, 7 }
0x109b   :  { %824 = vtanh.f32 %v650_v53 }
0x109c   :  { %826 = vtanh.f32 %v651_v54 }
0x10a1   :  { %v825_v55 = vpop.eup %824 }
0x10a2   :  { %v827_v56 = vpop.eup %826  ;;  %668 = vrot.lane.b32.xlu1 %v825_v55, %s859_s0  ;;  %v654_v61 = vmul.f32 0.5, %v825_v55 }
0x10a3   :  { %670 = vrot.lane.b32.xlu2 %v827_v56, %s859_s0  ;;  %v655_v57 = vmul.f32 0.5, %v827_v56 }
0x10a4   :  { %v656_v62 = vadd.f32 0.5, %v654_v61 }
0x10a5   :  { %v657_v58 = vadd.f32 0.5, %v655_v57 }
0x10a6   :  { %v664_v5 = vmul.f32 %v660_v4, %v656_v62 }
0x10a7   :  { %v665_v0 = vmul.f32 %v661_v11, %v657_v58 }
0x10fd   :  { %v671_v59 = vpop.permute.xlu2 %670 }
0x10fe   :  { %v675_v60 = vmul.f32 %v671_v59, %v657_v58 }
0x1100   :  { %680 = vrot.lane.b32.xlu1 %v675_v60, %s860_s1 }
0x1114   :  { %v669_v63 = vpop.permute.xlu1 %668 }
0x1115   :  { %v674_v13 = vmul.f32 %v669_v63, %v656_v62 }
0x1117   :  { %678 = vrot.lane.b32.xlu0 %v674_v13, %s860_s1 }
0x1172   :  { %v681_v1 = vpop.permute.xlu1 %680 }
0x1173   :  { %v685_v2 = vadd.f32 %v681_v1, %v665_v0 }
0x1175   :  { %828 = vtanh.f32 %v685_v2 }
0x117b   :  { %v829_v3 = vpop.eup %828 }
0x117c   :  { %692 = vrot.lane.b32.xlu0 %v829_v3, %s861_s24 }
0x1189   :  { %v679_v6 = vpop.permute.xlu0 %678 }
0x118a   :  { %v684_v7 = vadd.f32 %v679_v6, %v664_v5 }
0x118c   :  { %830 = vtanh.f32 %v684_v7 }
0x1192   :  { %v831_v8 = vpop.eup %830 }
0x1193   :  { %690 = vrot.lane.b32.xlu2 %v831_v8, %s861_s24 }
0x11ed   :  { %v691_v12 = vpop.permute.xlu2 %690 }
0x11ee   :  { %v693_v14 = vpop.permute.xlu0 %692  ;;  %v696_v15 = vmul.f32 %v691_v12, %v656_v62 }
0x11ef   :  { %v697_v16 = vmul.f32 %v693_v14, %v657_v58 }
0x11f0   :  { %v704_v17 = vrot.slane %v696_v15, 7 }
0x11f1   :  { %v705_v18 = vrot.slane %v697_v16, 6 }
0x11f3   :  { %v706_v19 = vsel %vm129_vm2, %v705_v18, %v704_v17 }
0x11f4   :  { %707 = vrot.lane.b32.xlu1 %v706_v19, %s862_s25 }
0x1266   :  { %v708_v20 = vpop.permute.xlu1 %707 }
0x1267   :  { %759 = vmatmul.msk.f32.vlgmr.msra.gmra.mxu2 %vm56_vm3, %v708_v20 }
0x12ea   :  { %v728_v22 = vpop.f32.mrf.mxu2 }
0x12eb   :  { %v729_v23 = vadd.f32 %v767_v21, %v728_v22 }
0x12ed   :  { %732 = vst.msk [vmem:[#allocation2] sm:$0x3] %vm731_vm4, %v729_v23 }
0x12ee   :  { %743 = dma.vmem_to_hbm [thread:$0]  %s739_s6, 32, %s741_s9, [#allocation3]  }
0x12ef   :  { %856 = dma.done.wait [#allocation3], 32  }
0x12f0   :  { %857 = vsyncadd [#allocation3], 4294967264 }
0x12f1   :  { %748 = vsyncpa [#allocation3], 1 }

</bundles_post_ra>
